<compile_context>
chip_gen: v6e
topology: v6e:2x2x1
jax: 0.10.0
libtpu: 0.0.40
codegen_flags: <defaults>
</compile_context>

<pallas_src>
import math
import functools

import jax
import jax.numpy as jnp
from jax.experimental import pallas as pl
from jax.experimental.pallas import tpu as pltpu


NUM_FEATURES = 32
NUM_BINS = 11
NUM_CLASSES = 10
IN_DIM = NUM_FEATURES * NUM_BINS   # 352
H1_DIM = 384
H2_DIM = 192
OUT_PAD = 128                      # lane-dense padded class dimension


def mlp_kernel(x_ref, w1_ref, b1_ref, w2_ref, b2_ref, w3_ref, b3_ref, o_ref):
    """Fused 3-layer MLP: (ReLU(ReLU(x@W1+b1)@W2+b2))@W3+b3.

    All operands live in VMEM for the current batch tile; the three matmuls run
    back-to-back on the MXU with f32 accumulation, bias/ReLU on the VPU.
    Activations are cast to the weight dtype (f32 or bf16) on-chip before each
    dot so the bf16 path keeps bf16 MXU throughput on every layer without any
    HBM-side dtype conversion of x.
    """
    cdt = w1_ref.dtype
    x = x_ref[...].astype(cdt)

    h1 = jnp.dot(x, w1_ref[...], preferred_element_type=jnp.float32)
    h1 = jnp.maximum(h1 + b1_ref[...], 0.0).astype(cdt)

    h2 = jnp.dot(h1, w2_ref[...], preferred_element_type=jnp.float32)
    h2 = jnp.maximum(h2 + b2_ref[...], 0.0).astype(cdt)

    out = jnp.dot(h2, w3_ref[...], preferred_element_type=jnp.float32)
    o_ref[...] = (out + b3_ref[...]).astype(o_ref.dtype)


def _round_up(n, m):
    return ((n + m - 1) // m) * m


@functools.partial(jax.jit, static_argnames=("block_b", "compute_dtype"))
def representation_transformation(x, params, *, block_b=512,
                                  compute_dtype=jnp.float32):
    """x: (B, IN_DIM) float32. Returns logits (B, NUM_CLASSES) float32.

    params: (w1 (352,384), b1 (1,384), w2 (384,192), b2 (1,192),
             w3 (192,OUT_PAD) zero-padded, b3 (1,OUT_PAD) zero-padded).
    """
    w1, b1, w2, b2, w3, b3 = params
    B = x.shape[0]

    cdt = jnp.dtype(compute_dtype)
    if cdt != jnp.float32:
        # bf16 compute path (v6e/v7x): cast the (small) weights once here;
        # activations are cast inside the kernel so x never makes an extra
        # HBM round-trip.  Biases stay f32 (added to the f32 accumulator).
        w1 = w1.astype(cdt)
        w2 = w2.astype(cdt)
        w3 = w3.astype(cdt)

    # Batch tile: big enough to fill the MXU M dimension, multiple of 8
    # (sublane unit), and capped so large batches give >= 2 grid steps
    # (keeps both TensorCores busy on v7x).
    bb = max(8, min(block_b, _round_up(pl.cdiv(B, 2), 8)))
    grid = (pl.cdiv(B, bb),)   # ragged last block handled by masked stores

    out = pl.pallas_call(
        mlp_kernel,
        out_shape=jax.ShapeDtypeStruct((B, OUT_PAD), jnp.float32),
        grid_spec=pltpu.PrefetchScalarGridSpec(
            num_scalar_prefetch=0,
            grid=grid,
            in_specs=[
                # batch-tiled activations (last dim = full array dim 352)
                pl.BlockSpec((bb, IN_DIM), lambda i: (i, 0)),
                # weights/biases: full blocks, same block for every grid step
                # -> VMEM-resident across the batch loop.
                pl.BlockSpec((IN_DIM, H1_DIM), lambda i: (0, 0)),
                pl.BlockSpec((1, H1_DIM), lambda i: (0, 0)),
                pl.BlockSpec((H1_DIM, H2_DIM), lambda i: (0, 0)),
                pl.BlockSpec((1, H2_DIM), lambda i: (0, 0)),
                pl.BlockSpec((H2_DIM, OUT_PAD), lambda i: (0, 0)),
                pl.BlockSpec((1, OUT_PAD), lambda i: (0, 0)),
            ],
            # lane-dense (128-wide) output tile -> unmasked full-lane stores
            out_specs=pl.BlockSpec((bb, OUT_PAD), lambda i: (i, 0)),
        ),
        compiler_params=pltpu.CompilerParams(
            dimension_semantics=("parallel",),
        ),
    )(x, w1, b1, w2, b2, w3, b3)

    return out[:, :NUM_CLASSES]


def init_params(key):
    """Deterministic init mirroring PyTorch nn.Linear defaults:
    U(-1/sqrt(fan_in), 1/sqrt(fan_in)) for weight and bias.
    Weights returned as (in, out); biases as (1, out).
    The final layer is zero-padded once from NUM_CLASSES to OUT_PAD columns so
    the kernel's output is lane-dense; the pad columns are exactly zero."""
    dims = [(IN_DIM, H1_DIM), (H1_DIM, H2_DIM), (H2_DIM, NUM_CLASSES)]
    params = []
    for (fan_in, fan_out) in dims:
        key, kw, kb = jax.random.split(key, 3)
        bound = 1.0 / math.sqrt(fan_in)
        w = jax.random.uniform(kw, (fan_in, fan_out), jnp.float32, -bound, bound)
        b = jax.random.uniform(kb, (1, fan_out), jnp.float32, -bound, bound)
        params += [w, b]
    w3, b3 = params[4], params[5]
    params[4] = jnp.pad(w3, ((0, 0), (0, OUT_PAD - NUM_CLASSES)))
    params[5] = jnp.pad(b3, ((0, 0), (0, OUT_PAD - NUM_CLASSES)))
    return tuple(params)


def reference_mlp(x, params):
    """Pure-JAX reference (uses the unpadded slice of the last layer)."""
    w1, b1, w2, b2, w3, b3 = params
    h1 = jnp.maximum(x @ w1 + b1, 0.0)
    h2 = jnp.maximum(h1 @ w2 + b2, 0.0)
    return h2 @ w3[:, :NUM_CLASSES] + b3[:, :NUM_CLASSES]


if __name__ == "__main__":
    key = jax.random.PRNGKey(0)
    key, kx, kx2 = jax.random.split(key, 3)
    params = init_params(key)

    # Small batch (single grid step).
    B = 8
    x = jax.random.normal(kx, (B, IN_DIM), jnp.float32)
    out = jax.block_until_ready(representation_transformation(x, params))
    ref = reference_mlp(x, params)
    assert out.shape == (B, NUM_CLASSES)
    assert jnp.allclose(out, ref, atol=1e-4, rtol=1e-4), "mismatch vs reference"

    # Larger batch not a multiple of the tile (exercises ragged last block
    # + masked output store + multi-step "parallel" grid).
    B2 = 600
    x2 = jax.random.normal(kx2, (B2, IN_DIM), jnp.float32)
    out2 = jax.block_until_ready(representation_transformation(x2, params))
    ref2 = reference_mlp(x2, params)
    assert out2.shape == (B2, NUM_CLASSES)
    assert jnp.allclose(out2, ref2, atol=1e-4, rtol=1e-4), "ragged mismatch"

    # Optional bf16 compute path (looser tolerance, f32 accumulation kept).
    out_bf16 = jax.block_until_ready(
        representation_transformation(x, params, compute_dtype=jnp.bfloat16))
    assert out_bf16.shape == (B, NUM_CLASSES)
    assert jnp.allclose(out_bf16, ref, atol=5e-2, rtol=5e-2), "bf16 mismatch"

    print("KERNEL_OK")
</pallas_src>

<mosaic_0001>
module attributes {stable_mosaic.version = 11 : i64} {
  func.func @mlp_kernel(%arg0: i32, %arg1: memref<8x352xf32, #tpu.memory_space<vmem>>, %arg2: memref<352x384xf32, #tpu.memory_space<vmem>>, %arg3: memref<1x384xf32, #tpu.memory_space<vmem>>, %arg4: memref<384x192xf32, #tpu.memory_space<vmem>>, %arg5: memref<1x192xf32, #tpu.memory_space<vmem>>, %arg6: memref<192x128xf32, #tpu.memory_space<vmem>>, %arg7: memref<1x128xf32, #tpu.memory_space<vmem>>, %arg8: memref<8x128xf32, #tpu.memory_space<vmem>>) attributes {dimension_semantics = [#tpu.dimension_semantics<parallel>], iteration_bounds = array<i64: 1>, scalar_prefetch = 0 : i64, scratch_operands = 0 : i64, tpu.core_type = #tpu.core_type<tc>, window_params = [{transform_indices = @transform_0, window_bounds = array<i64: 8, 352>}, {pipeline_mode = #tpu.pipeline_mode<synchronous>, transform_indices = @transform_1, window_bounds = array<i64: 352, 384>}, {pipeline_mode = #tpu.pipeline_mode<synchronous>, transform_indices = @transform_2, window_bounds = array<i64: 1, 384>}, {pipeline_mode = #tpu.pipeline_mode<synchronous>, transform_indices = @transform_3, window_bounds = array<i64: 384, 192>}, {pipeline_mode = #tpu.pipeline_mode<synchronous>, transform_indices = @transform_4, window_bounds = array<i64: 1, 192>}, {pipeline_mode = #tpu.pipeline_mode<synchronous>, transform_indices = @transform_5, window_bounds = array<i64: 192, 128>}, {pipeline_mode = #tpu.pipeline_mode<synchronous>, transform_indices = @transform_6, window_bounds = array<i64: 1, 128>}, {transform_indices = @transform_7, window_bounds = array<i64: 8, 128>}]} {
    %c0 = arith.constant 0 : index
    %c0_0 = arith.constant 0 : index
    %0 = vector.load %arg1[%c0, %c0_0] : memref<8x352xf32, #tpu.memory_space<vmem>>, vector<8x352xf32>
    %c0_1 = arith.constant 0 : index
    %c0_2 = arith.constant 0 : index
    %1 = vector.load %arg2[%c0_1, %c0_2] : memref<352x384xf32, #tpu.memory_space<vmem>>, vector<352x384xf32>
    %cst = arith.constant dense<0.000000e+00> : vector<8x384xf32>
    %2 = tpu.matmul %0, %1, %cst {dimension_numbers = #tpu.dot_dimension_numbers<[1], [0], [0], [1], [0, 0, 1, 1], [], []>} : vector<8x352xf32>, vector<352x384xf32>, vector<8x384xf32> -> vector<8x384xf32>
    %c0_3 = arith.constant 0 : index
    %c0_4 = arith.constant 0 : index
    %3 = vector.load %arg3[%c0_3, %c0_4] : memref<1x384xf32, #tpu.memory_space<vmem>>, vector<1x384xf32>
    %4 = vector.broadcast %3 : vector<1x384xf32> to vector<8x384xf32>
    %5 = arith.addf %2, %4 : vector<8x384xf32>
    %cst_5 = arith.constant 0.000000e+00 : f32
    %6 = vector.broadcast %cst_5 : f32 to vector<8x384xf32>
    %7 = arith.maximumf %5, %6 : vector<8x384xf32>
    %c0_6 = arith.constant 0 : index
    %c0_7 = arith.constant 0 : index
    %8 = vector.load %arg4[%c0_6, %c0_7] : memref<384x192xf32, #tpu.memory_space<vmem>>, vector<384x192xf32>
    %cst_8 = arith.constant dense<0.000000e+00> : vector<8x192xf32>
    %9 = tpu.matmul %7, %8, %cst_8 {dimension_numbers = #tpu.dot_dimension_numbers<[1], [0], [0], [1], [0, 0, 1, 1], [], []>} : vector<8x384xf32>, vector<384x192xf32>, vector<8x192xf32> -> vector<8x192xf32>
    %c0_9 = arith.constant 0 : index
    %c0_10 = arith.constant 0 : index
    %10 = vector.load %arg5[%c0_9, %c0_10] : memref<1x192xf32, #tpu.memory_space<vmem>>, vector<1x192xf32>
    %11 = vector.broadcast %10 : vector<1x192xf32> to vector<8x192xf32>
    %12 = arith.addf %9, %11 : vector<8x192xf32>
    %cst_11 = arith.constant 0.000000e+00 : f32
    %13 = vector.broadcast %cst_11 : f32 to vector<8x192xf32>
    %14 = arith.maximumf %12, %13 : vector<8x192xf32>
    %c0_12 = arith.constant 0 : index
    %c0_13 = arith.constant 0 : index
    %15 = vector.load %arg6[%c0_12, %c0_13] : memref<192x128xf32, #tpu.memory_space<vmem>>, vector<192x128xf32>
    %cst_14 = arith.constant dense<0.000000e+00> : vector<8x128xf32>
    %16 = tpu.matmul %14, %15, %cst_14 {dimension_numbers = #tpu.dot_dimension_numbers<[1], [0], [0], [1], [0, 0, 1, 1], [], []>} : vector<8x192xf32>, vector<192x128xf32>, vector<8x128xf32> -> vector<8x128xf32>
    %c0_15 = arith.constant 0 : index
    %c0_16 = arith.constant 0 : index
    %17 = vector.load %arg7[%c0_15, %c0_16] : memref<1x128xf32, #tpu.memory_space<vmem>>, vector<1x128xf32>
    %18 = vector.broadcast %17 : vector<1x128xf32> to vector<8x128xf32>
    %19 = arith.addf %16, %18 : vector<8x128xf32>
    %c0_17 = arith.constant 0 : index
    %c0_18 = arith.constant 0 : index
    %20 = vector.load %arg8[%c0_17, %c0_18] : memref<8x128xf32, #tpu.memory_space<vmem>>, vector<8x128xf32>
    tpu.vector_store %arg8[%c0_17, %c0_18], %19 {strides = array<i32>} : memref<8x128xf32, #tpu.memory_space<vmem>>, vector<8x128xf32>,
    return
  }
  func.func @transform_0(%arg0: i32) -> (i32, i32) {
    %c0_i32 = arith.constant 0 : i32
    %c0_i32_0 = arith.constant 0 : i32
    return %arg0, %c0_i32 : i32, i32
  }
  func.func @transform_1(%arg0: i32) -> (i32, i32) {
    %c0_i32 = arith.constant 0 : i32
    %c0_i32_0 = arith.constant 0 : i32
    %c0_i32_1 = arith.constant 0 : i32
    return %c0_i32, %c0_i32_0 : i32, i32
  }
  func.func @transform_2(%arg0: i32) -> (i32, i32) {
    %c0_i32 = arith.constant 0 : i32
    %c0_i32_0 = arith.constant 0 : i32
    %c0_i32_1 = arith.constant 0 : i32
    return %c0_i32, %c0_i32_0 : i32, i32
  }
  func.func @transform_3(%arg0: i32) -> (i32, i32) {
    %c0_i32 = arith.constant 0 : i32
    %c0_i32_0 = arith.constant 0 : i32
    %c0_i32_1 = arith.constant 0 : i32
    return %c0_i32, %c0_i32_0 : i32, i32
  }
  func.func @transform_4(%arg0: i32) -> (i32, i32) {
    %c0_i32 = arith.constant 0 : i32
    %c0_i32_0 = arith.constant 0 : i32
    %c0_i32_1 = arith.constant 0 : i32
    return %c0_i32, %c0_i32_0 : i32, i32
  }
  func.func @transform_5(%arg0: i32) -> (i32, i32) {
    %c0_i32 = arith.constant 0 : i32
    %c0_i32_0 = arith.constant 0 : i32
    %c0_i32_1 = arith.constant 0 : i32
    return %c0_i32, %c0_i32_0 : i32, i32
  }
  func.func @transform_6(%arg0: i32) -> (i32, i32) {
    %c0_i32 = arith.constant 0 : i32
    %c0_i32_0 = arith.constant 0 : i32
    %c0_i32_1 = arith.constant 0 : i32
    return %c0_i32, %c0_i32_0 : i32, i32
  }
  func.func @transform_7(%arg0: i32) -> (i32, i32) {
    %c0_i32 = arith.constant 0 : i32
    %c0_i32_0 = arith.constant 0 : i32
    return %arg0, %c0_i32 : i32, i32
  }
}

</mosaic_0001>

<bundles_post_ra>
// kernel: representation_transformation.1
= control target key start
LH: loop header
LB: loop body
LE: loop exit
PB: predicated region body
PF: predicated region fallthrough
CT: control target
= control target key end

     0   :  { %s1830_s0 = inlined_call_operand.vmem [shape: f32[8,352], index: 0, kind: input, shape index: {}]   ;;  %s1831_s1 = inlined_call_operand.vmem [shape: f32[352,384], index: 1, kind: input, shape index: {}]   ;;  %s1832_s2 = inlined_call_operand.vmem [shape: f32[1,384], index: 2, kind: input, shape index: {}]   ;;  %s1833_s3 = inlined_call_operand.vmem [shape: f32[384,192], index: 3, kind: input, shape index: {}]   ;;  %s1834_s4 = inlined_call_operand.vmem [shape: f32[1,192], index: 4, kind: input, shape index: {}]   ;;  %s1835_s5 = inlined_call_operand.vmem [shape: f32[192,128], index: 5, kind: input, shape index: {}]   ;;  %s1836_s6 = inlined_call_operand.vmem [shape: f32[1,128], index: 6, kind: input, shape index: {}]   ;;  %s1837_s7 = inlined_call_operand.hbm [shape: f32[8,128], index: 7, kind: output, shape index: {}]  }
   0x1   :  { %v76_v0 = vld [vmem:[%s1831_s1 + $0x170] sm:$0xff]  ;;  %v75_v1 = vld [vmem:[%s1831_s1 + $0x168] sm:$0xff]  ;;  %v73_v2 = vld [vmem:[%s1831_s1 + $0x158] sm:$0xff] }
   0x2   :  { %183 = vmatprep.subr.mxu0 %v76_v0  ;;  %v72_v3 = vld [vmem:[%s1831_s1 + $0x150] sm:$0xff]  ;;  %v70_v4 = vld [vmem:[%s1831_s1 + $0x140] sm:$0xff]  ;;  %v69_v5 = vld [vmem:[%s1831_s1 + $0x138] sm:$0xff] }
   0x3   :  { %184 = vmatpush1.msra.mxu0 %v75_v1  ;;  %v67_v6 = vld [vmem:[%s1831_s1 + $0x128] sm:$0xff]  ;;  %v66_v7 = vld [vmem:[%s1831_s1 + $0x120] sm:$0xff]  ;;  %v125_v8 = vld [vmem:[%s1831_s1 + $0x2f8] sm:$0xff] }
   0x4   :  { %185 = vmatprep.subr.mxu0 %v73_v2  ;;  %v64_v9 = vld [vmem:[%s1831_s1 + $0x110] sm:$0xff]  ;;  %844 = vmatprep.subr.mxu1 %v125_v8  ;;  %v77_v10 = vld [vmem:[%s1831_s1 + $0x178] sm:$0xff]  ;;  %v63_v11 = vld [vmem:[%s1831_s1 + $0x108] sm:$0xff] }
   0x5   :  { %186 = vmatpush1.msra.mxu0 %v72_v3  ;;  %845 = vmatpush3.msra.mxu1 %v77_v10  ;;  %v122_v12 = vld [vmem:[%s1831_s1 + $0x2e0] sm:$0xff]  ;;  %v61_v14 = vld [vmem:[%s1831_s1 + $0xf8] sm:$0xff]  ;;  %v119_v15 = vld [vmem:[%s1831_s1 + $0x2c8] sm:$0xff] }
   0x6   :  { %187 = vmatprep.subr.mxu0 %v70_v4  ;;  %v74_v13 = vld [vmem:[%s1831_s1 + $0x160] sm:$0xff]  ;;  %846 = vmatprep.subr.mxu1 %v122_v12  ;;  %v60_v16 = vld [vmem:[%s1831_s1 + $0xf0] sm:$0xff]  ;;  %v71_v17 = vld [vmem:[%s1831_s1 + $0x148] sm:$0xff] }
   0x7   :  { %188 = vmatpush1.msra.mxu0 %v69_v5  ;;  %847 = vmatpush3.msra.mxu1 %v74_v13  ;;  %v116_v18 = vld [vmem:[%s1831_s1 + $0x2b0] sm:$0xff]  ;;  %v58_v19 = vld [vmem:[%s1831_s1 + $0xe0] sm:$0xff]  ;;  %v57_v21 = vld [vmem:[%s1831_s1 + $0xd8] sm:$0xff]  ;;  %v944_v13 = vmov 0.0  }
   0x8   :  { %189 = vmatprep.subr.mxu0 %v67_v6  ;;  %848 = vmatprep.subr.mxu1 %v119_v15  ;;  %v68_v20 = vld [vmem:[%s1831_s1 + $0x130] sm:$0xff]  ;;  %v113_v22 = vld [vmem:[%s1831_s1 + $0x298] sm:$0xff]  ;;  %v55_v23 = vld [vmem:[%s1831_s1 + $0xc8] sm:$0xff] }
   0x9   :  { %190 = vmatpush1.msra.mxu0 %v66_v7  ;;  %849 = vmatpush3.msra.mxu1 %v71_v17  ;;  %v65_v24 = vld [vmem:[%s1831_s1 + $0x118] sm:$0xff]  ;;  %v54_v25 = vld [vmem:[%s1831_s1 + $0xc0] sm:$0xff]  ;;  %v52_v27 = vld [vmem:[%s1831_s1 + $0xb0] sm:$0xff] }
   0xa   :  { %191 = vmatprep.subr.mxu0 %v64_v9  ;;  %850 = vmatprep.subr.mxu1 %v116_v18  ;;  %v110_v26 = vld [vmem:[%s1831_s1 + $0x280] sm:$0xff]  ;;  %v51_v29 = vld [vmem:[%s1831_s1 + $0xa8] sm:$0xff]  ;;  %v49_v31 = vld [vmem:[%s1831_s1 + $0x98] sm:$0xff] }
   0xb   :  { %192 = vmatpush1.msra.mxu0 %v63_v11  ;;  %851 = vmatpush3.msra.mxu1 %v68_v20  ;;  %v62_v28 = vld [vmem:[%s1831_s1 + $0x100] sm:$0xff]  ;;  %v107_v30 = vld [vmem:[%s1831_s1 + $0x268] sm:$0xff]  ;;  %v48_v33 = vld [vmem:[%s1831_s1 + $0x90] sm:$0xff] }
   0xc   :  { %193 = vmatprep.subr.mxu0 %v61_v14  ;;  %852 = vmatprep.subr.mxu1 %v113_v22  ;;  %v59_v32 = vld [vmem:[%s1831_s1 + $0xe8] sm:$0xff]  ;;  %v104_v34 = vld [vmem:[%s1831_s1 + $0x250] sm:$0xff]  ;;  %v46_v35 = vld [vmem:[%s1831_s1 + $0x80] sm:$0xff] }
   0xd   :  { %194 = vmatpush1.msra.mxu0 %v60_v16  ;;  %853 = vmatpush3.msra.mxu1 %v65_v24  ;;  %v56_v36 = vld [vmem:[%s1831_s1 + $0xd0] sm:$0xff]  ;;  %v45_v37 = vld [vmem:[%s1831_s1 + $0x78] sm:$0xff]  ;;  %v43_v39 = vld [vmem:[%s1831_s1 + $0x68] sm:$0xff] }
   0xe   :  { %195 = vmatprep.subr.mxu0 %v58_v19  ;;  %854 = vmatprep.subr.mxu1 %v110_v26  ;;  %v101_v38 = vld [vmem:[%s1831_s1 + $0x238] sm:$0xff]  ;;  %v42_v41 = vld [vmem:[%s1831_s1 + $0x60] sm:$0xff]  ;;  %v40_v43 = vld [vmem:[%s1831_s1 + $0x50] sm:$0xff] }
   0xf   :  { %196 = vmatpush1.msra.mxu0 %v57_v21  ;;  %855 = vmatpush3.msra.mxu1 %v62_v28  ;;  %v53_v40 = vld [vmem:[%s1831_s1 + $0xb8] sm:$0xff]  ;;  %v98_v42 = vld [vmem:[%s1831_s1 + $0x220] sm:$0xff]  ;;  %v39_v45 = vld [vmem:[%s1831_s1 + $0x48] sm:$0xff] }
  0x10   :  { %197 = vmatprep.subr.mxu0 %v55_v23  ;;  %856 = vmatprep.subr.mxu1 %v107_v30  ;;  %v50_v44 = vld [vmem:[%s1831_s1 + $0xa0] sm:$0xff]  ;;  %v95_v46 = vld [vmem:[%s1831_s1 + $0x208] sm:$0xff]  ;;  %v37_v47 = vld [vmem:[%s1831_s1 + $0x38] sm:$0xff] }
  0x11   :  { %198 = vmatpush1.msra.mxu0 %v54_v25  ;;  %857 = vmatpush3.msra.mxu1 %v59_v32  ;;  %v47_v48 = vld [vmem:[%s1831_s1 + $0x88] sm:$0xff]  ;;  %v36_v49 = vld [vmem:[%s1831_s1 + $0x30] sm:$0xff]  ;;  %v34_v51 = vld [vmem:[%s1831_s1 + $0x20] sm:$0xff] }
  0x12   :  { %199 = vmatprep.subr.mxu0 %v52_v27  ;;  %858 = vmatprep.subr.mxu1 %v104_v34  ;;  %v92_v50 = vld [vmem:[%s1831_s1 + $0x1f0] sm:$0xff]  ;;  %v33_v53 = vld [vmem:[%s1831_s1 + $0x18] sm:$0xff]  ;;  %v31_v55 = vld [vmem:[%s1831_s1 + $0x8] sm:$0xff] }
  0x13   :  { %200 = vmatpush1.msra.mxu0 %v51_v29  ;;  %859 = vmatpush3.msra.mxu1 %v56_v36  ;;  %v44_v52 = vld [vmem:[%s1831_s1 + $0x70] sm:$0xff]  ;;  %v89_v54 = vld [vmem:[%s1831_s1 + $0x1d8] sm:$0xff]  ;;  %v30_v57 = vld [vmem:[%s1831_s1] sm:$0xff] }
  0x14   :  { %201 = vmatprep.subr.mxu0 %v49_v31  ;;  %860 = vmatprep.subr.mxu1 %v101_v38  ;;  %v41_v56 = vld [vmem:[%s1831_s1 + $0x58] sm:$0xff]  ;;  %v86_v58 = vld [vmem:[%s1831_s1 + $0x1c0] sm:$0xff]  ;;  %v124_v59 = vld [vmem:[%s1831_s1 + $0x2f0] sm:$0xff] }
  0x15   :  { %202 = vmatpush1.msra.mxu0 %v48_v33  ;;  %861 = vmatpush3.msra.mxu1 %v53_v40  ;;  %v38_v60 = vld [vmem:[%s1831_s1 + $0x40] sm:$0xff]  ;;  %v123_v61 = vld [vmem:[%s1831_s1 + $0x2e8] sm:$0xff]  ;;  %v121_v63 = vld [vmem:[%s1831_s1 + $0x2d8] sm:$0xff] }
  0x16   :  { %203 = vmatprep.subr.mxu0 %v46_v35  ;;  %862 = vmatprep.subr.mxu1 %v98_v42  ;;  %v83_v62 = vld [vmem:[%s1831_s1 + $0x1a8] sm:$0xff]  ;;  %v120_v1 = vld [vmem:[%s1831_s1 + $0x2d0] sm:$0xff]  ;;  %v118_v3 = vld [vmem:[%s1831_s1 + $0x2c0] sm:$0xff] }
  0x17   :  { %204 = vmatpush1.msra.mxu0 %v45_v37  ;;  %863 = vmatpush3.msra.mxu1 %v50_v44  ;;  %v35_v0 = vld [vmem:[%s1831_s1 + $0x28] sm:$0xff]  ;;  %v80_v2 = vld [vmem:[%s1831_s1 + $0x190] sm:$0xff]  ;;  %v117_v5 = vld [vmem:[%s1831_s1 + $0x2b8] sm:$0xff] }
  0x18   :  { %205 = vmatprep.subr.mxu0 %v43_v39  ;;  %864 = vmatprep.subr.mxu1 %v95_v46  ;;  %v32_v4 = vld [vmem:[%s1831_s1 + $0x10] sm:$0xff]  ;;  %v1200_v6 = vld [vmem:[%s1830_s0 + $0x8] sm:$0xff]  ;;  %v114_v8 = vld [vmem:[%s1831_s1 + $0x2a0] sm:$0xff] }
  0x19   :  { %206 = vmatpush1.msra.mxu0 %v42_v41  ;;  %865 = vmatpush3.msra.mxu1 %v47_v48  ;;  %v115_v7 = vld [vmem:[%s1831_s1 + $0x2a8] sm:$0xff]  ;;  %v1211_v9 = vld [vmem:[%s1830_s0] sm:$0xff]  ;;  %v112_v10 = vld [vmem:[%s1831_s1 + $0x290] sm:$0xff] }
  0x1a   :  { %207 = vmatprep.subr.mxu0 %v40_v43  ;;  %866 = vmatprep.subr.mxu1 %v92_v50  ;;  %v161_v11 = vld [vmem:[%s1831_s1 + $0x418] sm:$0xff]  ;;  %v111_v12 = vld [vmem:[%s1831_s1 + $0x288] sm:$0xff]  ;;  %v158_v15 = vld [vmem:[%s1831_s1 + $0x400] sm:$0xff] }
  0x1b   :  { %208 = vmatpush1.msra.mxu0 %v39_v45  ;;  %867 = vmatpush3.msra.mxu1 %v44_v52  ;;  %v109_v14 = vld [vmem:[%s1831_s1 + $0x278] sm:$0xff]  ;;  %v108_v16 = vld [vmem:[%s1831_s1 + $0x270] sm:$0xff]  ;;  %v106_v17 = vld [vmem:[%s1831_s1 + $0x260] sm:$0xff] }
  0x1c   :  { %209 = vmatprep.subr.mxu0 %v37_v47  ;;  %868 = vmatprep.subr.mxu1 %v89_v54  ;;  %v155_v18 = vld [vmem:[%s1831_s1 + $0x3e8] sm:$0xff]  ;;  %v105_v19 = vld [vmem:[%s1831_s1 + $0x258] sm:$0xff]  ;;  %v152_v21 = vld [vmem:[%s1831_s1 + $0x3d0] sm:$0xff] }
  0x1d   :  { %210 = vmatpush1.msra.mxu0 %v36_v49  ;;  %869 = vmatpush3.msra.mxu1 %v41_v56  ;;  %v103_v20 = vld [vmem:[%s1831_s1 + $0x248] sm:$0xff]  ;;  %v102_v22 = vld [vmem:[%s1831_s1 + $0x240] sm:$0xff]  ;;  %v100_v23 = vld [vmem:[%s1831_s1 + $0x230] sm:$0xff] }
  0x1e   :  { %211 = vmatprep.subr.mxu0 %v34_v51  ;;  %870 = vmatprep.subr.mxu1 %v86_v58  ;;  %v149_v24 = vld [vmem:[%s1831_s1 + $0x3b8] sm:$0xff]  ;;  %v99_v25 = vld [vmem:[%s1831_s1 + $0x228] sm:$0xff]  ;;  %v146_v27 = vld [vmem:[%s1831_s1 + $0x3a0] sm:$0xff] }
  0x1f   :  { %212 = vmatpush1.msra.mxu0 %v33_v53  ;;  %871 = vmatpush3.msra.mxu1 %v38_v60  ;;  %v97_v26 = vld [vmem:[%s1831_s1 + $0x218] sm:$0xff]  ;;  %v96_v28 = vld [vmem:[%s1831_s1 + $0x210] sm:$0xff]  ;;  %v94_v29 = vld [vmem:[%s1831_s1 + $0x200] sm:$0xff] }
  0x20   :  { %213 = vmatprep.subr.mxu0 %v31_v55  ;;  %872 = vmatprep.subr.mxu1 %v83_v62  ;;  %v143_v30 = vld [vmem:[%s1831_s1 + $0x388] sm:$0xff]  ;;  %v93_v31 = vld [vmem:[%s1831_s1 + $0x1f8] sm:$0xff]  ;;  %v90_v33 = vld [vmem:[%s1831_s1 + $0x1e0] sm:$0xff] }
  0x21   :  { %214 = vmatpush1.msra.mxu0 %v30_v57  ;;  %873 = vmatpush3.msra.mxu1 %v35_v0  ;;  %v91_v32 = vld [vmem:[%s1831_s1 + $0x1e8] sm:$0xff]  ;;  %v140_v34 = vld [vmem:[%s1831_s1 + $0x370] sm:$0xff]  ;;  %v137_v37 = vld [vmem:[%s1831_s1 + $0x358] sm:$0xff] }
  0x22   :  { %215 = vmatprep.subr.mxu0 %v124_v59  ;;  %874 = vmatprep.subr.mxu1 %v80_v2  ;;  %v88_v35 = vld [vmem:[%s1831_s1 + $0x1d0] sm:$0xff]  ;;  %v87_v36 = vld [vmem:[%s1831_s1 + $0x1c8] sm:$0xff]  ;;  %v85_v38 = vld [vmem:[%s1831_s1 + $0x1b8] sm:$0xff] }
  0x23   :  { %216 = vmatpush2.msra.mxu0 %v123_v61  ;;  %875 = vmatpush3.msra.mxu1 %v32_v4  ;;  %v84_v39 = vld [vmem:[%s1831_s1 + $0x1b0] sm:$0xff]  ;;  %v134_v40 = vld [vmem:[%s1831_s1 + $0x340] sm:$0xff]  ;;  %v81_v42 = vld [vmem:[%s1831_s1 + $0x198] sm:$0xff] }
  0x24   :  { %217 = vmatprep.subr.mxu0 %v121_v63  ;;  %389 = vmatprep.mubr.f32.mxu1 %v1200_v6  ;;  %v82_v41 = vld [vmem:[%s1831_s1 + $0x1a0] sm:$0xff]  ;;  %v131_v43 = vld [vmem:[%s1831_s1 + $0x328] sm:$0xff]  ;;  %v128_v46 = vld [vmem:[%s1831_s1 + $0x310] sm:$0xff] }
  0x25   :  { %218 = vmatpush2.msra.mxu0 %v120_v1  ;;  %892 = vmatprep.subr.mxu1 %v944_v13  ;;  %v79_v44 = vld [vmem:[%s1831_s1 + $0x188] sm:$0xff]  ;;  %v78_v45 = vld [vmem:[%s1831_s1 + $0x180] sm:$0xff]  ;;  %v160_v47 = vld [vmem:[%s1831_s1 + $0x410] sm:$0xff] }
  0x26   :  { %219 = vmatprep.subr.mxu0 %v118_v3  ;;  %390 = vmatmul.mubr.f32.vlgmr.msra.gmra.mxu1 %v1211_v9 }
  0x27   :  { %220 = vmatpush2.msra.mxu0 %v117_v5  ;;  %893 = vmatpush3.msra.mxu1 %v161_v11 }
  0x28   :  { %221 = vmatprep.subr.mxu0 %v115_v7  ;;  %894 = vmatprep.subr.mxu1 %v944_v13 }
  0x29   :  { %222 = vmatpush2.msra.mxu0 %v114_v8  ;;  %895 = vmatpush3.msra.mxu1 %v158_v15 }
  0x2a   :  { %223 = vmatprep.subr.mxu0 %v112_v10  ;;  %896 = vmatprep.subr.mxu1 %v944_v13 }
  0x2b   :  { %224 = vmatpush2.msra.mxu0 %v111_v12  ;;  %897 = vmatpush3.msra.mxu1 %v155_v18 }
  0x2c   :  { %225 = vmatprep.subr.mxu0 %v109_v14  ;;  %898 = vmatprep.subr.mxu1 %v944_v13 }
  0x2d   :  { %226 = vmatpush2.msra.mxu0 %v108_v16  ;;  %899 = vmatpush3.msra.mxu1 %v152_v21 }
  0x2e   :  { %227 = vmatprep.subr.mxu0 %v106_v17  ;;  %900 = vmatprep.subr.mxu1 %v944_v13 }
  0x2f   :  { %228 = vmatpush2.msra.mxu0 %v105_v19  ;;  %901 = vmatpush3.msra.mxu1 %v149_v24 }
  0x30   :  { %229 = vmatprep.subr.mxu0 %v103_v20  ;;  %902 = vmatprep.subr.mxu1 %v944_v13 }
  0x31   :  { %230 = vmatpush2.msra.mxu0 %v102_v22  ;;  %903 = vmatpush3.msra.mxu1 %v146_v27 }
  0x32   :  { %231 = vmatprep.subr.mxu0 %v100_v23  ;;  %904 = vmatprep.subr.mxu1 %v944_v13 }
  0x33   :  { %232 = vmatpush2.msra.mxu0 %v99_v25  ;;  %905 = vmatpush3.msra.mxu1 %v143_v30 }
  0x34   :  { %233 = vmatprep.subr.mxu0 %v97_v26  ;;  %906 = vmatprep.subr.mxu1 %v944_v13 }
  0x35   :  { %234 = vmatpush2.msra.mxu0 %v96_v28  ;;  %247 = vmatprep.mubr.f32.mxu0 %v1200_v6 }
  0x36   :  { %235 = vmatprep.subr.mxu0 %v94_v29  ;;  %907 = vmatpush3.msra.mxu1 %v140_v34 }
  0x37   :  { %236 = vmatpush2.msra.mxu0 %v93_v31  ;;  %908 = vmatprep.subr.mxu1 %v944_v13 }
  0x38   :  { %237 = vmatprep.subr.mxu0 %v91_v32  ;;  %909 = vmatpush3.msra.mxu1 %v137_v37 }
  0x39   :  { %238 = vmatpush2.msra.mxu0 %v90_v33  ;;  %910 = vmatprep.subr.mxu1 %v944_v13 }
  0x3a   :  { %239 = vmatprep.subr.mxu0 %v88_v35  ;;  %911 = vmatpush3.msra.mxu1 %v134_v40 }
  0x3b   :  { %240 = vmatpush2.msra.mxu0 %v87_v36  ;;  %912 = vmatprep.subr.mxu1 %v944_v13 }
  0x3c   :  { %241 = vmatprep.subr.mxu0 %v85_v38  ;;  %913 = vmatpush3.msra.mxu1 %v131_v43 }
  0x3d   :  { %242 = vmatpush2.msra.mxu0 %v84_v39 }
  0x3e   :  { %243 = vmatprep.subr.mxu0 %v82_v41 }
  0x3f   :  { %244 = vmatpush2.msra.mxu0 %v81_v42 }
  0x40   :  { %12 = vsyncpa [#allocation3], 0  ;;  %245 = vmatprep.subr.mxu0 %v79_v44  ;;  %v159_v48 = vld [vmem:[%s1831_s1 + $0x408] sm:$0xff]  ;;  %914 = vmatprep.subr.mxu1 %v944_v13  ;;  %v157_v49 = vld [vmem:[%s1831_s1 + $0x3f8] sm:$0xff]  ;;  %vm179_vm0 = vcmask 785408   ;;  %vm945_vm1 = vmmov 0  }
  0x41   :  { %246 = vmatpush2.msra.mxu0 %v78_v45  ;;  %915 = vmatpush3.msra.mxu1 %v128_v46  ;;  %v1348_v50 = vld [vmem:[%s1830_s0 + $0x10] sm:$0xff]  ;;  %v154_v52 = vld [vmem:[%s1831_s1 + $0x3e0] sm:$0xff]  ;;  %v563_v53 = vld [vmem:[%s1833_s3 + $0x2f8] sm:$0xff]  ;;  %vm751_vm2 = vcmask 523264   ;;  %s946_s8 = smov [#allocation2]  }
  0x42   :  { %248 = vmatmul.mubr.f32.vlgmr.msra.gmra.mxu0 %v1211_v9  ;;  %262 = vmatprep.subr.mxu0 %v160_v47  ;;  %v156_v51 = vld [vmem:[%s1831_s1 + $0x3f0] sm:$0xff]  ;;  %v153_v54 = vld [vmem:[%s1831_s1 + $0x3d8] sm:$0xff]  ;;  %v151_v56 = vld [vmem:[%s1831_s1 + $0x3c8] sm:$0xff]  ;;  %s832_s9 = sshll.u32 %s946_s8, 4  ;;  %s833_s9 = int_to_ptr.vmem [resolvable:$true] %s832_s9 }
  0x43   :  { %263 = vmatpush1.msra.mxu0 %v159_v48  ;;  %916 = vmatprep.mubr.msk.f32.mxu1 %vm945_vm1, %v944_v13  ;;  %v562_v55 = vld [vmem:[%s1833_s3 + $0x2f0] sm:$0xff]  ;;  %v561_v57 = vld [vmem:[%s1833_s3 + $0x2e8] sm:$0xff]  ;;  %v150_v58 = vld [vmem:[%s1831_s1 + $0x3c0] sm:$0xff]  ;;  %s922_s10 = scalar_lea.vmem %s833_s9, 128  ;;  %p927_p1 = scmp.lt.s32.totalorder %s833_s9, %s833_s9 }
  0x44   :  { %264 = vmatprep.subr.mxu0 %v157_v49  ;;  %917 = vmatmul.mubr.msk.f32.vlgmr.msra.gmra.mxu1 %vm179_vm0, %v1348_v50  ;;  %v560_v59 = vld [vmem:[%s1833_s3 + $0x2e0] sm:$0xff]  ;;  %v148_v60 = vld [vmem:[%s1831_s1 + $0x3b0] sm:$0xff]  ;;  %v559_v61 = vld [vmem:[%s1833_s3 + $0x2d8] sm:$0xff]  ;;  %p923_p0 = scmp.ne.s32.totalorder %s833_s9, %s922_s10  ;;  %p928_p2 = scmp.lt.s32.totalorder %s922_s10, %s922_s10 }
  0x45   :  { %265 = vmatpush1.msra.mxu0 %v156_v51  ;;  %318 = vmatprep.mubr.f32.mxu0 %v944_v13  ;;  %v147_v62 = vld [vmem:[%s1831_s1 + $0x3a8] sm:$0xff]  ;;  %v558_v63 = vld [vmem:[%s1833_s3 + $0x2d0] sm:$0xff]  ;;  %v145_v0 = vld [vmem:[%s1831_s1 + $0x398] sm:$0xff] }
  0x46   :  { %266 = vmatprep.subr.mxu0 %v154_v52  ;;  %647 = vmatprep.subr.mxu1 %v563_v53  ;;  %v557_v1 = vld [vmem:[%s1833_s3 + $0x2c8] sm:$0xff]  ;;  %v144_v2 = vld [vmem:[%s1831_s1 + $0x390] sm:$0xff]  ;;  %v556_v3 = vld [vmem:[%s1833_s3 + $0x2c0] sm:$0xff]  ;;  %p929_p3 = por %p928_p2, %p927_p1 }
  0x47   :  { %267 = vmatpush1.msra.mxu0 %v153_v54  ;;  %648 = vmatpush1.msra.mxu1 %v562_v55  ;;  %v142_v4 = vld [vmem:[%s1831_s1 + $0x380] sm:$0xff]  ;;  %v555_v5 = vld [vmem:[%s1833_s3 + $0x2b8] sm:$0xff]  ;;  %v554_v7 = vld [vmem:[%s1833_s3 + $0x2b0] sm:$0xff] }
  0x48   :  { %268 = vmatprep.subr.mxu0 %v151_v56  ;;  %649 = vmatprep.subr.mxu1 %v561_v57  ;;  %v141_v6 = vld [vmem:[%s1831_s1 + $0x378] sm:$0xff]  ;;  %v139_v8 = vld [vmem:[%s1831_s1 + $0x368] sm:$0xff]  ;;  %v138_v10 = vld [vmem:[%s1831_s1 + $0x360] sm:$0xff]  ;;  %p930_p4 = pnand %p929_p3, %p923_p0 }
  0x49   :  { %269 = vmatpush1.msra.mxu0 %v150_v58  ;;  %650 = vmatpush1.msra.mxu1 %v560_v59  ;;  %v553_v9 = vld [vmem:[%s1833_s3 + $0x2a8] sm:$0xff]  ;;  %v552_v11 = vld [vmem:[%s1833_s3 + $0x2a0] sm:$0xff]  ;;  %v136_v12 = vld [vmem:[%s1831_s1 + $0x350] sm:$0xff] }
  0x4a   :  { %270 = vmatprep.subr.mxu0 %v148_v60  ;;  %651 = vmatprep.subr.mxu1 %v559_v61  ;;  %v551_v14 = vld [vmem:[%s1833_s3 + $0x298] sm:$0xff]  ;;  %v135_v15 = vld [vmem:[%s1831_s1 + $0x348] sm:$0xff]  ;;  %v550_v16 = vld [vmem:[%s1833_s3 + $0x290] sm:$0xff] }
  0x4b   :  { %271 = vmatpush1.msra.mxu0 %v147_v62  ;;  %652 = vmatpush1.msra.mxu1 %v558_v63  ;;  %v133_v17 = vld [vmem:[%s1831_s1 + $0x338] sm:$0xff]  ;;  %v549_v18 = vld [vmem:[%s1833_s3 + $0x288] sm:$0xff]  ;;  %v132_v19 = vld [vmem:[%s1831_s1 + $0x330] sm:$0xff] }
  0x4c   :  { %272 = vmatprep.subr.mxu0 %v145_v0  ;;  %653 = vmatprep.subr.mxu1 %v557_v1  ;;  %v548_v20 = vld [vmem:[%s1833_s3 + $0x280] sm:$0xff]  ;;  %v547_v22 = vld [vmem:[%s1833_s3 + $0x278] sm:$0xff]  ;;  %v546_v24 = vld [vmem:[%s1833_s3 + $0x270] sm:$0xff] }
  0x4d   :  { %273 = vmatpush1.msra.mxu0 %v144_v2  ;;  %654 = vmatpush1.msra.mxu1 %v556_v3  ;;  %v130_v21 = vld [vmem:[%s1831_s1 + $0x320] sm:$0xff]  ;;  %v129_v23 = vld [vmem:[%s1831_s1 + $0x318] sm:$0xff]  ;;  %v127_v25 = vld [vmem:[%s1831_s1 + $0x308] sm:$0xff] }
  0x4e   :  { %274 = vmatprep.subr.mxu0 %v142_v4  ;;  %655 = vmatprep.subr.mxu1 %v555_v5  ;;  %v545_v26 = vld [vmem:[%s1833_s3 + $0x268] sm:$0xff]  ;;  %v126_v27 = vld [vmem:[%s1831_s1 + $0x300] sm:$0xff]  ;;  %v499_v28 = vld [vmem:[%s1833_s3 + $0xf8] sm:$0xff] }
  0x4f   :  { %275 = vmatpush1.msra.mxu0 %v141_v6  ;;  %656 = vmatpush1.msra.mxu1 %v554_v7  ;;  %v498_v29 = vld [vmem:[%s1833_s3 + $0xf0] sm:$0xff]  ;;  %v497_v30 = vld [vmem:[%s1833_s3 + $0xe8] sm:$0xff]  ;;  %v496_v31 = vld [vmem:[%s1833_s3 + $0xe0] sm:$0xff] }
  0x50   :  { %276 = vmatprep.subr.mxu0 %v139_v8  ;;  %657 = vmatprep.subr.mxu1 %v553_v9  ;;  %v495_v32 = vld [vmem:[%s1833_s3 + $0xd8] sm:$0xff]  ;;  %v494_v33 = vld [vmem:[%s1833_s3 + $0xd0] sm:$0xff]  ;;  %v493_v34 = vld [vmem:[%s1833_s3 + $0xc8] sm:$0xff] }
  0x51   :  { %277 = vmatpush1.msra.mxu0 %v138_v10  ;;  %658 = vmatpush1.msra.mxu1 %v552_v11  ;;  %v492_v35 = vld [vmem:[%s1833_s3 + $0xc0] sm:$0xff]  ;;  %v491_v36 = vld [vmem:[%s1833_s3 + $0xb8] sm:$0xff]  ;;  %v490_v37 = vld [vmem:[%s1833_s3 + $0xb0] sm:$0xff] }
  0x52   :  { %278 = vmatprep.subr.mxu0 %v136_v12  ;;  %659 = vmatprep.subr.mxu1 %v551_v14  ;;  %v489_v38 = vld [vmem:[%s1833_s3 + $0xa8] sm:$0xff]  ;;  %v488_v39 = vld [vmem:[%s1833_s3 + $0xa0] sm:$0xff]  ;;  %v487_v40 = vld [vmem:[%s1833_s3 + $0x98] sm:$0xff] }
  0x53   :  { %279 = vmatpush1.msra.mxu0 %v135_v15  ;;  %660 = vmatpush1.msra.mxu1 %v550_v16  ;;  %v486_v41 = vld [vmem:[%s1833_s3 + $0x90] sm:$0xff]  ;;  %v485_v42 = vld [vmem:[%s1833_s3 + $0x88] sm:$0xff]  ;;  %v484_v43 = vld [vmem:[%s1833_s3 + $0x80] sm:$0xff] }
  0x54   :  { %280 = vmatprep.subr.mxu0 %v133_v17  ;;  %661 = vmatprep.subr.mxu1 %v549_v18  ;;  %v483_v44 = vld [vmem:[%s1833_s3 + $0x78] sm:$0xff]  ;;  %v482_v45 = vld [vmem:[%s1833_s3 + $0x70] sm:$0xff]  ;;  %v481_v46 = vld [vmem:[%s1833_s3 + $0x68] sm:$0xff] }
  0x55   :  { %281 = vmatpush1.msra.mxu0 %v132_v19  ;;  %662 = vmatpush1.msra.mxu1 %v548_v20  ;;  %v480_v47 = vld [vmem:[%s1833_s3 + $0x60] sm:$0xff]  ;;  %v479_v48 = vld [vmem:[%s1833_s3 + $0x58] sm:$0xff]  ;;  %v478_v49 = vld [vmem:[%s1833_s3 + $0x50] sm:$0xff] }
  0x56   :  { %282 = vmatprep.subr.mxu0 %v130_v21  ;;  %663 = vmatprep.subr.mxu1 %v547_v22  ;;  %v476_v51 = vld [vmem:[%s1833_s3 + $0x40] sm:$0xff]  ;;  %v475_v52 = vld [vmem:[%s1833_s3 + $0x38] sm:$0xff]  ;;  %v474_v53 = vld [vmem:[%s1833_s3 + $0x30] sm:$0xff] }
  0x57   :  { %283 = vmatpush1.msra.mxu0 %v129_v23  ;;  %664 = vmatpush1.msra.mxu1 %v546_v24  ;;  %v473_v54 = vld [vmem:[%s1833_s3 + $0x28] sm:$0xff]  ;;  %v472_v55 = vld [vmem:[%s1833_s3 + $0x20] sm:$0xff]  ;;  %v471_v56 = vld [vmem:[%s1833_s3 + $0x18] sm:$0xff] }
  0x58   :  { %284 = vmatprep.subr.mxu0 %v127_v25  ;;  %665 = vmatprep.subr.mxu1 %v545_v26  ;;  %v470_v57 = vld [vmem:[%s1833_s3 + $0x10] sm:$0xff]  ;;  %v469_v58 = vld [vmem:[%s1833_s3 + $0x8] sm:$0xff]  ;;  %v468_v59 = vld [vmem:[%s1833_s3] sm:$0xff] }
  0x59   :  { %285 = vmatpush1.msra.mxu0 %v126_v27  ;;  %711 = vmatprep.mubr.f32.mxu1 %v944_v13  ;;  %v531_v60 = vld [vmem:[%s1833_s3 + $0x1f8] sm:$0xff]  ;;  %v544_v61 = vld [vmem:[%s1833_s3 + $0x260] sm:$0xff]  ;;  %v530_v62 = vld [vmem:[%s1833_s3 + $0x1f0] sm:$0xff] }
  0x5a   :  { %840 = vmatmul.mubr.msk.f32.vlgmr.msra.gmra.mxu0 %vm179_vm0, %v1348_v50  ;;  %576 = vmatprep.subr.mxu0 %v499_v28  ;;  %v477_v50 = vld [vmem:[%s1833_s3 + $0x48] sm:$0xff]  ;;  %v543_v63 = vld [vmem:[%s1833_s3 + $0x258] sm:$0xff]  ;;  %v542_v1 = vld [vmem:[%s1833_s3 + $0x250] sm:$0xff] }
  0x5b   :  { %577 = vmatpush1.msra.mxu0 %v498_v29  ;;  %666 = vmatpush1.msra.mxu1 %v544_v61  ;;  %v529_v0 = vld [vmem:[%s1833_s3 + $0x1e8] sm:$0xff]  ;;  %v528_v2 = vld [vmem:[%s1833_s3 + $0x1e0] sm:$0xff]  ;;  %v527_v4 = vld [vmem:[%s1833_s3 + $0x1d8] sm:$0xff] }
  0x5c   :  { %578 = vmatprep.subr.mxu0 %v497_v30  ;;  %667 = vmatprep.subr.mxu1 %v543_v63  ;;  %v541_v3 = vld [vmem:[%s1833_s3 + $0x248] sm:$0xff]  ;;  %v540_v5 = vld [vmem:[%s1833_s3 + $0x240] sm:$0xff]  ;;  %v526_v6 = vld [vmem:[%s1833_s3 + $0x1d0] sm:$0xff] }
  0x5d   :  { %579 = vmatpush1.msra.mxu0 %v496_v31  ;;  %668 = vmatpush1.msra.mxu1 %v542_v1  ;;  %v539_v7 = vld [vmem:[%s1833_s3 + $0x238] sm:$0xff]  ;;  %v525_v8 = vld [vmem:[%s1833_s3 + $0x1c8] sm:$0xff]  ;;  %v538_v9 = vld [vmem:[%s1833_s3 + $0x230] sm:$0xff] }
  0x5e   :  { %580 = vmatprep.subr.mxu0 %v495_v32  ;;  %669 = vmatprep.subr.mxu1 %v541_v3  ;;  %v524_v10 = vld [vmem:[%s1833_s3 + $0x1c0] sm:$0xff]  ;;  %v537_v11 = vld [vmem:[%s1833_s3 + $0x228] sm:$0xff]  ;;  %v523_v12 = vld [vmem:[%s1833_s3 + $0x1b8] sm:$0xff] }
  0x5f   :  { %581 = vmatpush1.msra.mxu0 %v494_v33  ;;  %670 = vmatpush1.msra.mxu1 %v540_v5  ;;  %v536_v14 = vld [vmem:[%s1833_s3 + $0x220] sm:$0xff]  ;;  %v522_v15 = vld [vmem:[%s1833_s3 + $0x1b0] sm:$0xff]  ;;  %v535_v16 = vld [vmem:[%s1833_s3 + $0x218] sm:$0xff] }
  0x60   :  { %582 = vmatprep.subr.mxu0 %v493_v34  ;;  %671 = vmatprep.subr.mxu1 %v539_v7  ;;  %v521_v17 = vld [vmem:[%s1833_s3 + $0x1a8] sm:$0xff]  ;;  %v534_v18 = vld [vmem:[%s1833_s3 + $0x210] sm:$0xff]  ;;  %v520_v19 = vld [vmem:[%s1833_s3 + $0x1a0] sm:$0xff] }
  0x61   :  { %583 = vmatpush1.msra.mxu0 %v492_v35  ;;  %672 = vmatpush1.msra.mxu1 %v538_v9  ;;  %v533_v20 = vld [vmem:[%s1833_s3 + $0x208] sm:$0xff]  ;;  %v519_v21 = vld [vmem:[%s1833_s3 + $0x198] sm:$0xff]  ;;  %v532_v22 = vld [vmem:[%s1833_s3 + $0x200] sm:$0xff] }
  0x62   :  { %584 = vmatprep.subr.mxu0 %v491_v36  ;;  %673 = vmatprep.subr.mxu1 %v537_v11  ;;  %v518_v23 = vld [vmem:[%s1833_s3 + $0x190] sm:$0xff]  ;;  %v517_v24 = vld [vmem:[%s1833_s3 + $0x188] sm:$0xff]  ;;  %v516_v25 = vld [vmem:[%s1833_s3 + $0x180] sm:$0xff] }
  0x63   :  { %585 = vmatpush1.msra.mxu0 %v490_v37  ;;  %674 = vmatpush1.msra.mxu1 %v536_v14  ;;  %v515_v26 = vld [vmem:[%s1833_s3 + $0x178] sm:$0xff]  ;;  %v514_v27 = vld [vmem:[%s1833_s3 + $0x170] sm:$0xff]  ;;  %v513_v28 = vld [vmem:[%s1833_s3 + $0x168] sm:$0xff] }
  0x64   :  { %586 = vmatprep.subr.mxu0 %v489_v38  ;;  %675 = vmatprep.subr.mxu1 %v535_v16  ;;  %v512_v29 = vld [vmem:[%s1833_s3 + $0x160] sm:$0xff]  ;;  %v511_v30 = vld [vmem:[%s1833_s3 + $0x158] sm:$0xff]  ;;  %v510_v31 = vld [vmem:[%s1833_s3 + $0x150] sm:$0xff] }
  0x65   :  { %587 = vmatpush1.msra.mxu0 %v488_v39  ;;  %676 = vmatpush1.msra.mxu1 %v534_v18  ;;  %v509_v32 = vld [vmem:[%s1833_s3 + $0x148] sm:$0xff]  ;;  %v508_v33 = vld [vmem:[%s1833_s3 + $0x140] sm:$0xff]  ;;  %v507_v34 = vld [vmem:[%s1833_s3 + $0x138] sm:$0xff] }
  0x66   :  { %588 = vmatprep.subr.mxu0 %v487_v40  ;;  %677 = vmatprep.subr.mxu1 %v533_v20  ;;  %v506_v35 = vld [vmem:[%s1833_s3 + $0x130] sm:$0xff]  ;;  %v505_v36 = vld [vmem:[%s1833_s3 + $0x128] sm:$0xff]  ;;  %v504_v37 = vld [vmem:[%s1833_s3 + $0x120] sm:$0xff] }
  0x67   :  { %589 = vmatpush1.msra.mxu0 %v486_v41  ;;  %678 = vmatpush1.msra.mxu1 %v532_v22  ;;  %v503_v38 = vld [vmem:[%s1833_s3 + $0x118] sm:$0xff]  ;;  %v502_v39 = vld [vmem:[%s1833_s3 + $0x110] sm:$0xff]  ;;  %v501_v40 = vld [vmem:[%s1833_s3 + $0x108] sm:$0xff] }
  0x68   :  { %590 = vmatprep.subr.mxu0 %v485_v42  ;;  %755 = vmatprep.subr.mxu1 %v944_v13  ;;  %v500_v41 = vld [vmem:[%s1833_s3 + $0x100] sm:$0xff]  ;;  %v164_v42 = vlaneseq  ;;  %v729_v63 = vld [vmem:[%s1835_s5 + $0x48] sm:$0xff]  ;;  %v723_v18 = vld [vmem:[%s1835_s5 + $0x18] sm:$0xff] }
  0x69   :  { %591 = vmatpush1.msra.mxu0 %v484_v43  ;;  %v728_v1 = vld [vmem:[%s1835_s5 + $0x40] sm:$0xff]  ;;  %v725_v16 = vld [vmem:[%s1835_s5 + $0x28] sm:$0xff]  ;;  %v743_v22 = vld [vmem:[%s1835_s5 + $0xb8] sm:$0xff] }
  0x6a   :  { %592 = vmatprep.subr.mxu0 %v483_v44  ;;  %v1710_v44 = vshrl.u32 %v164_v42, 7  ;;  %v721_v20 = vld [vmem:[%s1835_s5 + $0x8] sm:$0xff]  ;;  %v842_v42 = vld [vmem:[%s1836_s6] ss:$0 sm:$0xff] }
  0x6b   :  { %593 = vmatpush1.msra.mxu0 %v482_v45 }
  0x6c   :  { %594 = vmatprep.subr.mxu0 %v481_v46  ;;  %v174_v45 = vsub.s32 2, %v1710_v44  ;;  %v166_v61 = vsub.s32 0, %v1710_v44 }
  0x6d   :  { %595 = vmatpush1.msra.mxu0 %v480_v47  ;;  %v162_v47 = vld [vmem:[%s1832_s2] sm:$0x7] }
  0x6e   :  { %596 = vmatprep.subr.mxu0 %v479_v48 }
  0x6f   :  { %597 = vmatpush1.msra.mxu0 %v478_v49  ;;  %v175_v49 = vrot.slane %v162_v47, %v174_v45 }
  0x70   :  { %598 = vmatprep.subr.mxu0 %v477_v50 }
  0x71   :  { %599 = vmatpush1.msra.mxu0 %v476_v51 }
  0x72   :  { %600 = vmatprep.subr.mxu0 %v475_v52 }
  0x73   :  { %601 = vmatpush1.msra.mxu0 %v474_v53 }
  0x74   :  { %602 = vmatprep.subr.mxu0 %v473_v54 }
  0x75   :  { %603 = vmatpush1.msra.mxu0 %v472_v55  ;;  %v735_v55 = vld [vmem:[%s1835_s5 + $0x78] sm:$0xff] }
  0x76   :  { %604 = vmatprep.subr.mxu0 %v471_v56  ;;  %v734_v56 = vld [vmem:[%s1835_s5 + $0x70] sm:$0xff] }
  0x77   :  { %605 = vmatpush1.msra.mxu0 %v470_v57  ;;  %v733_v57 = vld [vmem:[%s1835_s5 + $0x68] sm:$0xff] }
  0x78   :  { %606 = vmatprep.subr.mxu0 %v469_v58  ;;  %v732_v58 = vld [vmem:[%s1835_s5 + $0x60] sm:$0xff] }
  0x79   :  { %607 = vmatpush1.msra.mxu0 %v468_v59  ;;  %v731_v59 = vld [vmem:[%s1835_s5 + $0x58] sm:$0xff] }
  0x7a   :  { %608 = vmatprep.subr.mxu0 %v531_v60  ;;  %v730_v60 = vld [vmem:[%s1835_s5 + $0x50] sm:$0xff] }
  0x7b   :  { %609 = vmatpush2.msra.mxu0 %v530_v62  ;;  %v170_v62 = vsub.s32 1, %v1710_v44 }
  0x7c   :  { %610 = vmatprep.subr.mxu0 %v529_v0 }
  0x7d   :  { %611 = vmatpush2.msra.mxu0 %v528_v2  ;;  %v167_v2 = vrot.slane %v162_v47, %v166_v61  ;;  %v171_v3 = vrot.slane %v162_v47, %v170_v62 }
  0x7e   :  { %612 = vmatprep.subr.mxu0 %v527_v4  ;;  %v727_v4 = vld [vmem:[%s1835_s5 + $0x38] sm:$0xff] }
  0x7f   :  { %613 = vmatpush2.msra.mxu0 %v526_v6 }
  0x80   :  { %614 = vmatprep.subr.mxu0 %v525_v8 }
  0x81   :  { %615 = vmatpush2.msra.mxu0 %v524_v10 }
  0x82   :  { %616 = vmatprep.subr.mxu0 %v523_v12 }
  0x83   :  { %617 = vmatpush2.msra.mxu0 %v522_v15  ;;  %v726_v15 = vld [vmem:[%s1835_s5 + $0x30] sm:$0xff] }
  0x84   :  { %618 = vmatprep.subr.mxu0 %v521_v17  ;;  %v724_v17 = vld [vmem:[%s1835_s5 + $0x20] sm:$0xff] }
  0x85   :  { %619 = vmatpush2.msra.mxu0 %v520_v19  ;;  %v722_v19 = vld [vmem:[%s1835_s5 + $0x10] sm:$0xff] }
  0x86   :  { %620 = vmatprep.subr.mxu0 %v519_v21  ;;  %v720_v21 = vld [vmem:[%s1835_s5] sm:$0xff] }
  0x87   :  { %621 = vmatpush2.msra.mxu0 %v518_v23  ;;  %v742_v23 = vld [vmem:[%s1835_s5 + $0xb0] sm:$0xff] }
  0x88   :  { %622 = vmatprep.subr.mxu0 %v517_v24  ;;  %v741_v24 = vld [vmem:[%s1835_s5 + $0xa8] sm:$0xff] }
  0x89   :  { %623 = vmatpush2.msra.mxu0 %v516_v25  ;;  %v740_v25 = vld [vmem:[%s1835_s5 + $0xa0] sm:$0xff] }
  0x8a   :  { %624 = vmatprep.subr.mxu0 %v515_v26  ;;  %v739_v26 = vld [vmem:[%s1835_s5 + $0x98] sm:$0xff] }
  0x8b   :  { %625 = vmatpush2.msra.mxu0 %v514_v27  ;;  %v738_v27 = vld [vmem:[%s1835_s5 + $0x90] sm:$0xff] }
  0x8c   :  { %626 = vmatprep.subr.mxu0 %v513_v28  ;;  %v737_v28 = vld [vmem:[%s1835_s5 + $0x88] sm:$0xff] }
  0x8d   :  { %627 = vmatpush2.msra.mxu0 %v512_v29  ;;  %v736_v29 = vld [vmem:[%s1835_s5 + $0x80] sm:$0xff] }
  0x8e   :  { %628 = vmatprep.subr.mxu0 %v511_v30  ;;  %v564_v30 = vld [vmem:[%s1834_s4] sm:$0x3] }
  0x8f   :  { %629 = vmatpush2.msra.mxu0 %v510_v31  ;;  %v569_v31 = vrot.slane %v564_v30, %v166_v61 }
  0x90   :  { %630 = vmatprep.subr.mxu0 %v509_v32  ;;  %v573_v32 = vrot.slane %v564_v30, %v170_v62 }
  0x91   :  { %631 = vmatpush2.msra.mxu0 %v508_v33 }
  0x92   :  { %632 = vmatprep.subr.mxu0 %v507_v34 }
  0x93   :  { %633 = vmatpush2.msra.mxu0 %v506_v35 }
  0x94   :  { %634 = vmatprep.subr.mxu0 %v505_v36 }
  0x95   :  { %635 = vmatpush2.msra.mxu0 %v504_v37 }
  0x96   :  { %636 = vmatprep.subr.mxu0 %v503_v38 }
  0x97   :  { %637 = vmatpush2.msra.mxu0 %v502_v39 }
  0x98   :  { %638 = vmatprep.subr.mxu0 %v501_v40 }
  0x99   :  { %639 = vmatpush2.msra.mxu0 %v500_v41 }
  0xe6   :  { %v876_v43 = vpop.f32.mrf.mxu1 }
  0xe8   :  { %v877_v46 = vpop.f32.mrf.mxu1 }
  0xe9   :  { %v878_v48 = vadd.f32 %v877_v46, %v876_v43 }
  0xeb   :  { %v392_v50 = vadd.f32 %v878_v48, %v175_v49 }
 0x102   :  { %v249_v0 = vpop.f32.mrf.mxu0 }
 0x103   :  { %v250_v6 = vadd.f32 %v249_v0, %v167_v2 }
 0x104   :  { %v461_v51 = vpop.f32.mrf.mxu1  ;;  %v251_v5 = vpop.f32.mrf.mxu0 }
 0x105   :  { %v462_v52 = vadd.f32 %v461_v51, %v392_v50  ;;  %v252_v8 = vadd.f32 %v251_v5, %v171_v3 }
 0x106   :  { %v918_v53 = vpop.f32.mrf.mxu1 }
 0x107   :  { %v467_v54 = vmax.f32 %v462_v52, 0.0 }
 0x109   :  { %712 = vmatmul.mubr.f32.vlgmr.msra.gmra.mxu1 %v467_v54 }
 0x10a   :  { %756 = vmatpush1.msra.mxu1 %v735_v55 }
 0x10b   :  { %757 = vmatprep.subr.mxu1 %v944_v13 }
 0x10c   :  { %758 = vmatpush1.msra.mxu1 %v734_v56 }
 0x10d   :  { %759 = vmatprep.subr.mxu1 %v944_v13 }
 0x10e   :  { %760 = vmatpush1.msra.mxu1 %v733_v57 }
 0x10f   :  { %761 = vmatprep.subr.mxu1 %v944_v13 }
 0x110   :  { %762 = vmatpush1.msra.mxu1 %v732_v58 }
 0x111   :  { %763 = vmatprep.subr.mxu1 %v944_v13 }
 0x112   :  { %764 = vmatpush1.msra.mxu1 %v731_v59 }
 0x113   :  { %765 = vmatprep.subr.mxu1 %v944_v13 }
 0x114   :  { %766 = vmatpush1.msra.mxu1 %v730_v60 }
 0x115   :  { %767 = vmatprep.subr.mxu1 %v944_v13 }
 0x116   :  { %768 = vmatpush1.msra.mxu1 %v729_v63 }
 0x117   :  { %769 = vmatprep.subr.mxu1 %v944_v13 }
 0x118   :  { %770 = vmatpush1.msra.mxu1 %v728_v1 }
 0x119   :  { %771 = vmatprep.subr.mxu1 %v944_v13 }
 0x11a   :  { %v320_v7 = vpop.f32.mrf.mxu0  ;;  %772 = vmatpush1.msra.mxu1 %v727_v4 }
 0x11b   :  { %773 = vmatprep.subr.mxu1 %v944_v13  ;;  %v321_v9 = vadd.f32 %v320_v7, %v250_v6 }
 0x11c   :  { %v322_v10 = vpop.f32.mrf.mxu0  ;;  %774 = vmatpush1.msra.mxu1 %v726_v15 }
 0x11d   :  { %v323_v11 = vadd.f32 %v322_v10, %v252_v8  ;;  %v465_v14 = vmax.f32 %v321_v9, 0.0  ;;  %775 = vmatprep.subr.mxu1 %v944_v13 }
 0x11e   :  { %776 = vmatpush1.msra.mxu1 %v725_v16 }
 0x11f   :  { %v466_v12 = vmax.f32 %v323_v11, 0.0  ;;  %777 = vmatprep.subr.mxu1 %v944_v13 }
 0x120   :  { %778 = vmatpush1.msra.mxu1 %v724_v17 }
 0x121   :  { %640 = vmatprep.mubr.f32.mxu0 %v466_v12  ;;  %779 = vmatprep.subr.mxu1 %v944_v13 }
 0x122   :  { %641 = vmatmul.mubr.f32.vlgmr.msra.gmra.mxu0 %v465_v14  ;;  %780 = vmatpush1.msra.mxu1 %v723_v18 }
 0x123   :  { %781 = vmatprep.subr.mxu1 %v944_v13 }
 0x124   :  { %782 = vmatpush1.msra.mxu1 %v722_v19 }
 0x125   :  { %783 = vmatprep.subr.mxu1 %v944_v13 }
 0x126   :  { %784 = vmatpush1.msra.mxu1 %v721_v20 }
 0x127   :  { %785 = vmatprep.subr.mxu1 %v944_v13 }
 0x128   :  { %786 = vmatpush1.msra.mxu1 %v720_v21 }
 0x129   :  { %803 = vmatprep.subr.mxu1 %v944_v13 }
 0x12a   :  { %804 = vmatpush2.msra.mxu1 %v743_v22 }
 0x12b   :  { %805 = vmatprep.subr.mxu1 %v944_v13 }
 0x12c   :  { %806 = vmatpush2.msra.mxu1 %v742_v23 }
 0x12d   :  { %807 = vmatprep.subr.mxu1 %v944_v13 }
 0x12e   :  { %808 = vmatpush2.msra.mxu1 %v741_v24 }
 0x12f   :  { %809 = vmatprep.subr.mxu1 %v944_v13 }
 0x130   :  { %810 = vmatpush2.msra.mxu1 %v740_v25 }
 0x131   :  { %811 = vmatprep.subr.mxu1 %v944_v13 }
 0x132   :  { %812 = vmatpush2.msra.mxu1 %v739_v26 }
 0x133   :  { %813 = vmatprep.subr.mxu1 %v944_v13 }
 0x134   :  { %814 = vmatpush2.msra.mxu1 %v738_v27 }
 0x135   :  { %815 = vmatprep.subr.mxu1 %v944_v13 }
 0x136   :  { %816 = vmatpush2.msra.mxu1 %v737_v28 }
 0x137   :  { %817 = vmatprep.subr.mxu1 %v944_v13 }
 0x138   :  { %818 = vmatpush2.msra.mxu1 %v736_v29 }
 0x1c9   :  { %v713_v33 = vpop.f32.mrf.mxu1 }
 0x1cb   :  { %v715_v38 = vpop.f32.mrf.mxu1 }
 0x1e2   :  { %v642_v34 = vpop.f32.mrf.mxu0 }
 0x1e3   :  { %v643_v35 = vadd.f32 %v642_v34, %v569_v31 }
 0x1e4   :  { %v644_v36 = vpop.f32.mrf.mxu0 }
 0x1e5   :  { %v645_v37 = vadd.f32 %v644_v36, %v573_v32  ;;  %v714_v39 = vadd.f32 %v713_v33, %v643_v35 }
 0x1e7   :  { %v716_v40 = vadd.f32 %v715_v38, %v645_v37  ;;  %v718_v41 = vmax.f32 %v714_v39, 0.0 }
 0x1e9   :  { %v719_v13 = vmax.f32 %v716_v40, 0.0 }
 0x1eb   :  { %843 = vmatprep.mubr.msk.f32.mxu1 %vm751_vm2, %v719_v13 }
 0x1ec   :  { %820 = vmatmul.mubr.f32.vlgmr.msra.gmra.mxu1 %v718_v41 }
 0x2ac   :  { %v821_v43 = vpop.f32.mrf.mxu1 }
 0x2ad   :  { %v822_v44 = vadd.f32 %v842_v42, %v821_v43 }
 0x2ae   :  { %v823_v45 = vpop.f32.mrf.mxu1 }
 0x2af   :  { %825 = vst [vmem:[#allocation2] sm:$0xff] %v822_v44 }
 0x2b0   :  { %933 = shalt.err (!%p930_p4)
}
 0x2b1   :  { %835 = dma.vmem_to_hbm [thread:$0]  %s833_s9, 128, %s1837_s7, [#allocation3]  }
 0x2b2   :  { %942 = dma.done.wait [#allocation3], 128  }
 0x2b3   :  { %943 = vsyncadd [#allocation3], 4294967168 }
 0x2b4   :  { %839 = vsyncpa [#allocation3], 1 }

</bundles_post_ra>
